<compile_context>
chip_gen: v6e
topology: v6e:2x2x1
jax: 0.10.0
libtpu: 0.0.40
codegen_flags: <defaults>
</compile_context>

<pallas_src>
import jax
import jax.numpy as jnp
from jax.experimental import pallas as pl
from jax.experimental.pallas import tpu as pltpu

INPUT_SIZE = 15
HIDDEN = 32
SEQ = 3
IN_DIM = SEQ * INPUT_SIZE            # 45
RNN_DIM = SEQ * HIDDEN               # 96
OUT_DIM = RNN_DIM + IN_DIM           # 141
DEFAULT_TILE_N = 4096                # rows per grid step (multiple of 8)
VMEM_LIMIT_BYTES = 48 * 1024 * 1024  # fits v5e/v6e/v7x physical VMEM


def rnnx_kernel(x_ref, w_in_ref, w_rec_ref, bias_ref, o_ref):
    """One batch tile of the unrolled 3-step Elman RNN (relu) + passthrough.

    x_ref:     (tile, 45)  float32  row-major input tile
    w_in_ref:  (45, 96)    float32  block-diagonal input projection (W_ih^T x3)
    w_rec_ref: (96, 96)    float32  shifted recurrent weight (W_hh^T, off-diag)
    bias_ref:  (1, 96)     float32  (b_ih + b_hh) tiled 3x
    o_ref:     (tile, 141)          [h1 | h2 | h3 | x]
    """
    x = x_ref[...]
    w_rec = w_rec_ref[...]

    # All three input projections in a single MXU call; bias folded in once.
    p = jnp.dot(x, w_in_ref[...], preferred_element_type=jnp.float32)
    p = p + bias_ref[...]                                   # (tile, 96)

    # Unrolled relu recurrence with no lane slicing.  h0 == 0, so the first
    # sweep is just relu(p); each extra sweep fixes one more hidden block.
    a = jnp.maximum(p, 0.0)                                 # [h1 |  * |  *]
    a = jnp.maximum(
        p + jnp.dot(a, w_rec, preferred_element_type=jnp.float32), 0.0)  # [h1|h2| *]
    a = jnp.maximum(
        p + jnp.dot(a, w_rec, preferred_element_type=jnp.float32), 0.0)  # [h1|h2|h3]

    # Two wide stores instead of six narrow masked ones.
    o_ref[:, 0:RNN_DIM] = a.astype(o_ref.dtype)
    o_ref[:, RNN_DIM:OUT_DIM] = x.astype(o_ref.dtype)


def rnnx_forward(x, w_ih, w_hh, b_ih, b_hh, *,
                 tile_n=DEFAULT_TILE_N, out_dtype=jnp.float32):
    """x: (N, 45) float32. Returns (N, 141) of `out_dtype` (default float32)."""
    x = jnp.asarray(x, jnp.float32)
    n = x.shape[0]

    wih_t = jnp.asarray(w_ih, jnp.float32).T                 # (15, 32)
    whh_t = jnp.asarray(w_hh, jnp.float32).T                 # (32, 32)
    bias = jnp.asarray(b_ih, jnp.float32) + jnp.asarray(b_hh, jnp.float32)

    # Block-diagonal input-projection weight: one dot does all 3 timesteps.
    w_in = jnp.zeros((IN_DIM, RNN_DIM), jnp.float32)
    for t in range(SEQ):
        w_in = w_in.at[t * INPUT_SIZE:(t + 1) * INPUT_SIZE,
                       t * HIDDEN:(t + 1) * HIDDEN].set(wih_t)
    # Shifted recurrent weight: (a @ w_rec)[:, (t+1)*32:(t+2)*32] = a_t @ W_hh^T.
    w_rec = jnp.zeros((RNN_DIM, RNN_DIM), jnp.float32)
    for t in range(SEQ - 1):
        w_rec = w_rec.at[t * HIDDEN:(t + 1) * HIDDEN,
                         (t + 1) * HIDDEN:(t + 2) * HIDDEN].set(whh_t)
    bias3 = jnp.tile(bias.reshape(1, HIDDEN), (1, SEQ))      # (1, 96)

    # Only 8-row alignment padding (<= 7 rows, and only when n % 8 != 0).
    # Non-divisible final grid blocks are handled by Pallas itself
    # (padded reads, masked writeback), so no whole-array pad/slice.
    n8 = (max(n, 1) + 7) // 8 * 8
    x_in = x if n8 == n else jnp.pad(x, ((0, n8 - n), (0, 0)))

    tile = max(8, (min(int(tile_n), n8) // 8) * 8)
    if n8 >= 16:
        # Keep >= 2 grid steps when possible: both v7x TensorCores get work
        # and the DMA pipeline has something to overlap.
        tile = min(tile, ((n8 + 1) // 2 + 7) // 8 * 8)
    grid = (pl.cdiv(n8, tile),)

    out = pl.pallas_call(
        rnnx_kernel,
        out_shape=jax.ShapeDtypeStruct((n8, OUT_DIM), out_dtype),
        grid=grid,
        in_specs=[
            pl.BlockSpec((tile, IN_DIM), lambda i: (i, 0)),
            pl.BlockSpec((IN_DIM, RNN_DIM), lambda i: (0, 0)),
            pl.BlockSpec((RNN_DIM, RNN_DIM), lambda i: (0, 0)),
            pl.BlockSpec((1, RNN_DIM), lambda i: (0, 0)),
        ],
        out_specs=pl.BlockSpec((tile, OUT_DIM), lambda i: (i, 0)),
        compiler_params=pltpu.CompilerParams(
            dimension_semantics=("parallel",),
            vmem_limit_bytes=VMEM_LIMIT_BYTES),
    )(x_in, w_in, w_rec, bias3)

    return out if n8 == n else out[:n]


def _reference(x, w_ih, w_hh, b_ih, b_hh):
    """Pure-JAX reference mirroring the PyTorch forward."""
    n = x.shape[0]
    xs = x.reshape(n, SEQ, INPUT_SIZE)
    h = jnp.zeros((n, HIDDEN), jnp.float32)
    outs = []
    for t in range(SEQ):
        h = jnp.maximum(xs[:, t] @ w_ih.T + b_ih + h @ w_hh.T + b_hh, 0.0)
        outs.append(h)
    rnn_out = jnp.stack(outs, axis=1).reshape(n, SEQ * HIDDEN)
    return jnp.concatenate([rnn_out, x], axis=1)


if __name__ == "__main__":
    key = jax.random.PRNGKey(0)
    k_x, k_wih, k_whh, k_bih, k_bhh = jax.random.split(key, 5)

    # Deterministic synthetic parameters (PyTorch-init-like scale 1/sqrt(H)).
    scale = 1.0 / jnp.sqrt(jnp.float32(HIDDEN))
    w_ih = jax.random.uniform(k_wih, (HIDDEN, INPUT_SIZE), jnp.float32,
                              -scale, scale)
    w_hh = jax.random.uniform(k_whh, (HIDDEN, HIDDEN), jnp.float32,
                              -scale, scale)
    b_ih = jax.random.uniform(k_bih, (HIDDEN,), jnp.float32, -scale, scale)
    b_hh = jax.random.uniform(k_bhh, (HIDDEN,), jnp.float32, -scale, scale)

    def _check(n, tile_n):
        kx = jax.random.fold_in(k_x, n)
        x = jax.random.normal(kx, (n, IN_DIM), jnp.float32)
        out = jax.block_until_ready(
            rnnx_forward(x, w_ih, w_hh, b_ih, b_hh, tile_n=tile_n))
        ref = _reference(x, w_ih, w_hh, b_ih, b_hh)
        assert out.shape == (n, OUT_DIM), out.shape
        assert jnp.allclose(out, ref, atol=1e-5, rtol=1e-5), f"mismatch (N={n})"

    _check(8, DEFAULT_TILE_N)   # single full tile
    _check(40, 16)              # multi-tile grid with a partial final block
    _check(13, DEFAULT_TILE_N)  # 8-row alignment pad/slice path

    print("KERNEL_OK")
</pallas_src>

<mosaic_0001>
module attributes {stable_mosaic.version = 11 : i64} {
  func.func @rnnx_kernel(%arg0: i32, %arg1: memref<8x45xf32, #tpu.memory_space<vmem>>, %arg2: memref<45x96xf32, #tpu.memory_space<vmem>>, %arg3: memref<96x96xf32, #tpu.memory_space<vmem>>, %arg4: memref<1x96xf32, #tpu.memory_space<vmem>>, %arg5: memref<8x141xf32, #tpu.memory_space<vmem>>) attributes {dimension_semantics = [#tpu.dimension_semantics<parallel>], iteration_bounds = array<i64: 1>, scalar_prefetch = 0 : i64, scratch_operands = 0 : i64, tpu.core_type = #tpu.core_type<tc>, window_params = [{transform_indices = @transform_0, window_bounds = array<i64: 8, 45>}, {pipeline_mode = #tpu.pipeline_mode<synchronous>, transform_indices = @transform_1, window_bounds = array<i64: 45, 96>}, {pipeline_mode = #tpu.pipeline_mode<synchronous>, transform_indices = @transform_2, window_bounds = array<i64: 96, 96>}, {pipeline_mode = #tpu.pipeline_mode<synchronous>, transform_indices = @transform_3, window_bounds = array<i64: 1, 96>}, {transform_indices = @transform_4, window_bounds = array<i64: 8, 141>}]} {
    %c0 = arith.constant 0 : index
    %c0_0 = arith.constant 0 : index
    %0 = vector.load %arg1[%c0, %c0_0] : memref<8x45xf32, #tpu.memory_space<vmem>>, vector<8x45xf32>
    %c0_1 = arith.constant 0 : index
    %c0_2 = arith.constant 0 : index
    %1 = vector.load %arg3[%c0_1, %c0_2] : memref<96x96xf32, #tpu.memory_space<vmem>>, vector<96x96xf32>
    %c0_3 = arith.constant 0 : index
    %c0_4 = arith.constant 0 : index
    %2 = vector.load %arg2[%c0_3, %c0_4] : memref<45x96xf32, #tpu.memory_space<vmem>>, vector<45x96xf32>
    %cst = arith.constant dense<0.000000e+00> : vector<8x96xf32>
    %3 = tpu.matmul %0, %2, %cst {dimension_numbers = #tpu.dot_dimension_numbers<[1], [0], [0], [1], [0, 0, 1, 1], [], []>} : vector<8x45xf32>, vector<45x96xf32>, vector<8x96xf32> -> vector<8x96xf32>
    %c0_5 = arith.constant 0 : index
    %c0_6 = arith.constant 0 : index
    %4 = vector.load %arg4[%c0_5, %c0_6] : memref<1x96xf32, #tpu.memory_space<vmem>>, vector<1x96xf32>
    %5 = vector.broadcast %4 : vector<1x96xf32> to vector<8x96xf32>
    %6 = arith.addf %3, %5 : vector<8x96xf32>
    %cst_7 = arith.constant 0.000000e+00 : f32
    %7 = vector.broadcast %cst_7 : f32 to vector<8x96xf32>
    %8 = arith.maximumf %6, %7 : vector<8x96xf32>
    %cst_8 = arith.constant dense<0.000000e+00> : vector<8x96xf32>
    %9 = tpu.matmul %8, %1, %cst_8 {dimension_numbers = #tpu.dot_dimension_numbers<[1], [0], [0], [1], [0, 0, 1, 1], [], []>} : vector<8x96xf32>, vector<96x96xf32>, vector<8x96xf32> -> vector<8x96xf32>
    %10 = arith.addf %6, %9 : vector<8x96xf32>
    %cst_9 = arith.constant 0.000000e+00 : f32
    %11 = vector.broadcast %cst_9 : f32 to vector<8x96xf32>
    %12 = arith.maximumf %10, %11 : vector<8x96xf32>
    %cst_10 = arith.constant dense<0.000000e+00> : vector<8x96xf32>
    %13 = tpu.matmul %12, %1, %cst_10 {dimension_numbers = #tpu.dot_dimension_numbers<[1], [0], [0], [1], [0, 0, 1, 1], [], []>} : vector<8x96xf32>, vector<96x96xf32>, vector<8x96xf32> -> vector<8x96xf32>
    %14 = arith.addf %6, %13 : vector<8x96xf32>
    %cst_11 = arith.constant 0.000000e+00 : f32
    %15 = vector.broadcast %cst_11 : f32 to vector<8x96xf32>
    %16 = arith.maximumf %14, %15 : vector<8x96xf32>
    %c0_12 = arith.constant 0 : index
    %c0_13 = arith.constant 0 : index
    %17 = vector.load %arg5[%c0_12, %c0_13] : memref<8x141xf32, #tpu.memory_space<vmem>>, vector<8x96xf32>
    tpu.vector_store %arg5[%c0_12, %c0_13], %16 {strides = array<i32>} : memref<8x141xf32, #tpu.memory_space<vmem>>, vector<8x96xf32>,
    %c0_14 = arith.constant 0 : index
    %c96 = arith.constant 96 : index
    %18 = vector.load %arg5[%c0_14, %c96] : memref<8x141xf32, #tpu.memory_space<vmem>>, vector<8x45xf32>
    tpu.vector_store %arg5[%c0_14, %c96], %0 {strides = array<i32>} : memref<8x141xf32, #tpu.memory_space<vmem>>, vector<8x45xf32>,
    return
  }
  func.func @transform_0(%arg0: i32) -> (i32, i32) {
    %c0_i32 = arith.constant 0 : i32
    %c0_i32_0 = arith.constant 0 : i32
    return %arg0, %c0_i32 : i32, i32
  }
  func.func @transform_1(%arg0: i32) -> (i32, i32) {
    %c0_i32 = arith.constant 0 : i32
    %c0_i32_0 = arith.constant 0 : i32
    %c0_i32_1 = arith.constant 0 : i32
    return %c0_i32, %c0_i32_0 : i32, i32
  }
  func.func @transform_2(%arg0: i32) -> (i32, i32) {
    %c0_i32 = arith.constant 0 : i32
    %c0_i32_0 = arith.constant 0 : i32
    %c0_i32_1 = arith.constant 0 : i32
    return %c0_i32, %c0_i32_0 : i32, i32
  }
  func.func @transform_3(%arg0: i32) -> (i32, i32) {
    %c0_i32 = arith.constant 0 : i32
    %c0_i32_0 = arith.constant 0 : i32
    %c0_i32_1 = arith.constant 0 : i32
    return %c0_i32, %c0_i32_0 : i32, i32
  }
  func.func @transform_4(%arg0: i32) -> (i32, i32) {
    %c0_i32 = arith.constant 0 : i32
    %c0_i32_0 = arith.constant 0 : i32
    return %arg0, %c0_i32 : i32, i32
  }
}

</mosaic_0001>

<bundles_post_ra>
// kernel: tpu_custom_call.1
= control target key start
LH: loop header
LB: loop body
LE: loop exit
PB: predicated region body
PF: predicated region fallthrough
CT: control target
= control target key end

     0   :  { %9 = vsyncpa [#allocation3], 0  ;;  %s627_s0 = inlined_call_operand.hbm [shape: f32[8,45], index: 0, kind: input, shape index: {}]   ;;  %s628_s1 = inlined_call_operand.hbm [shape: f32[45,96], index: 1, kind: input, shape index: {}]   ;;  %s629_s2 = inlined_call_operand.hbm [shape: f32[96,96], index: 2, kind: input, shape index: {}]   ;;  %s630_s3 = inlined_call_operand.vmem [shape: f32[1,96], index: 3, kind: input, shape index: {}]   ;;  %s631_s4 = inlined_call_operand.hbm [shape: f32[8,141], index: 4, kind: output, shape index: {}]  }
   0x1   :  { %10 = vsyncpa [#allocation6], 0 }
   0x2   :  { %11 = vsyncpa [#allocation4], 0  ;;  %s539_s15 = smov [#allocation5]  }
   0x3   :  { %s27_s16 = sshll.u32 %s539_s15, 4  ;;  %s28_s16 = int_to_ptr.vmem [resolvable:$true] %s27_s16 }
   0x4   :  { %s461_s17 = scalar_lea.vmem %s28_s16, 768  ;;  %p466_p1 = scmp.lt.s32.totalorder %s28_s16, %s28_s16 }
   0x5   :  { %p462_p0 = scmp.ne.s32.totalorder %s28_s16, %s461_s17  ;;  %p467_p2 = scmp.lt.s32.totalorder %s461_s17, %s461_s17 }
   0x7   :  { %p468_p3 = por %p467_p2, %p466_p1 }
   0x9   :  { %p469_p4 = pnand %p468_p3, %p462_p0 }
   0xb   :  { %472 = shalt.err (!%p469_p4)
}
   0xc   :  { %s540_s18 = smov 128   ;;  %s541_s19 = smov 8  }
   0xd   :  { %33 = dma.hbm_to_vmem [thread:$0]  %s628_s1, 768, %s28_s16, [#allocation6], %s540_s18, %s540_s18, %s541_s19  }
   0xe   :  { %s542_s22 = smov [#allocation2]   ;;  %s543_s24 = smov [#allocation7]  }
   0xf   :  { %s18_s23 = sshll.u32 %s542_s22, 4  ;;  %s39_s25 = sshll.u32 %s543_s24, 4  ;;  %s19_s23 = int_to_ptr.vmem [resolvable:$true] %s18_s23  ;;  %s40_s25 = int_to_ptr.vmem [resolvable:$true] %s39_s25 }
  0x10   :  { %s481_s26 = scalar_lea.vmem %s19_s23, 128  ;;  %p486_p6 = scmp.lt.s32.totalorder %s19_s23, %s19_s23 }
  0x11   :  { %p482_p5 = scmp.ne.s32.totalorder %s19_s23, %s481_s26  ;;  %p487_p7 = scmp.lt.s32.totalorder %s481_s26, %s481_s26 }
  0x13   :  { %p488_p8 = por %p487_p7, %p486_p6 }
  0x15   :  { %p489_p9 = pnand %p488_p8, %p482_p5 }
  0x17   :  { %492 = shalt.err (!%p489_p9)
}
  0x18   :  { %21 = dma.hbm_to_vmem [thread:$0]  %s627_s0, 128, %s19_s23, [#allocation3]  }
  0x19   :  { %s501_s29 = scalar_lea.vmem %s40_s25, 1536  ;;  %p506_p11 = scmp.lt.s32.totalorder %s40_s25, %s40_s25 }
  0x1a   :  { %p502_p10 = scmp.ne.s32.totalorder %s40_s25, %s501_s29  ;;  %p507_p12 = scmp.lt.s32.totalorder %s501_s29, %s501_s29 }
  0x1c   :  { %p508_p13 = por %p507_p12, %p506_p11 }
  0x1e   :  { %p509_p0 = pnand %p508_p13, %p502_p10 }
  0x20   :  { %512 = shalt.err (!%p509_p0)
}
  0x21   :  { %45 = dma.hbm_to_vmem [thread:$0]  %s629_s2, 1536, %s40_s25, [#allocation6], %s540_s18, %s540_s18, %s541_s19  }
  0x22   :  { %533 = dma.done.wait [#allocation3], 128  }
  0x23   :  { %534 = vsyncadd [#allocation3], 4294967168 }
  0x24   :  { %535 = dma.done.wait [#allocation6], 2304  }
  0x25   :  { %536 = vsyncadd [#allocation6], 4294964992  ;;  %v544_v0 = vmov 0.0   ;;  %vm545_vm0 = vmmov 0   ;;  %vm87_vm1 = vcmask 1044480   ;;  %v74_v2 = vld [vmem:[#allocation5 + $0x20] sm:$0xff] }
  0x26   :  { %375 = vmatprep.subr.mxu0 %v544_v0  ;;  %387 = vmatprep.mubr.msk.f32.mxu0 %vm545_vm0, %v544_v0  ;;  %v75_v1 = vld [vmem:[#allocation5 + $0x28] sm:$0x1f]  ;;  %v73_v3 = vld [vmem:[#allocation5 + $0x18] sm:$0xff]  ;;  %v68_v5 = vld [vmem:[#allocation7 + $0x50] sm:$0xff]  ;;  %vm83_vm2 = vcmask 367616   ;;  %vm162_vm3 = vcmask 785408  }
  0x27   :  { %390 = vmatprep.subr.mxu1 %v544_v0  ;;  %414 = vmatprep.mubr.msk.f32.mxu1 %vm545_vm0, %v544_v0  ;;  %v69_v4 = vld [vmem:[#allocation7 + $0x58] sm:$0xff]  ;;  %v72_v6 = vld [vmem:[#allocation5 + $0x10] sm:$0xff]  ;;  %v67_v7 = vld [vmem:[#allocation7 + $0x48] sm:$0xff]  ;;  %s546_s5 = smov 96   ;;  %vm319_vm4 = vcmask 105472   ;;  %vm317_vm5 = vcmask 1048320  }
  0x28   :  { %376 = vmatpush3.msk.msra.mxu0 %vm87_vm1, %v75_v1  ;;  %391 = vmatpush3.msra.mxu1 %v69_v4  ;;  %v71_v8 = vld [vmem:[#allocation5 + $0x8] sm:$0xff]  ;;  %v66_v9 = vld [vmem:[#allocation7 + $0x40] sm:$0xff]  ;;  %v70_v10 = vld [vmem:[#allocation5] sm:$0xff] }
  0x29   :  { %377 = vmatprep.subr.mxu0 %v544_v0  ;;  %392 = vmatprep.subr.mxu1 %v544_v0  ;;  %v65_v11 = vld [vmem:[#allocation7 + $0x38] sm:$0xff]  ;;  %v57_v12 = vld [vmem:[#allocation2] sm:$0xff]  ;;  %v64_v13 = vld [vmem:[#allocation7 + $0x30] sm:$0xff] }
  0x2a   :  { %378 = vmatpush3.msra.mxu0 %v74_v2  ;;  %393 = vmatpush3.msra.mxu1 %v68_v5  ;;  %v63_v14 = vld [vmem:[#allocation7 + $0x28] sm:$0xff]  ;;  %v62_v15 = vld [vmem:[#allocation7 + $0x20] sm:$0xff]  ;;  %v61_v16 = vld [vmem:[#allocation7 + $0x18] sm:$0xff] }
  0x2b   :  { %379 = vmatprep.subr.mxu0 %v544_v0  ;;  %394 = vmatprep.subr.mxu1 %v544_v0  ;;  %v60_v17 = vld [vmem:[#allocation7 + $0x10] sm:$0xff]  ;;  %v59_v18 = vld [vmem:[#allocation7 + $0x8] sm:$0xff]  ;;  %v58_v19 = vld [vmem:[#allocation7] sm:$0xff] }
  0x2c   :  { %380 = vmatpush3.msra.mxu0 %v73_v3  ;;  %395 = vmatpush3.msra.mxu1 %v67_v7  ;;  %v337_v20 = vld [vmem:[%s630_s3] ss:$0 sm:$0xff]  ;;  %s547_s3 = smov [#allocation8]  }
  0x2d   :  { %381 = vmatprep.subr.mxu0 %v544_v0  ;;  %396 = vmatprep.subr.mxu1 %v544_v0  ;;  %s327_s6 = sshll.u32 %s547_s3, 4  ;;  %s328_s6 = int_to_ptr.vmem [resolvable:$true] %s327_s6 }
  0x2e   :  { %382 = vmatpush3.msra.mxu0 %v72_v6  ;;  %397 = vmatpush3.msra.mxu1 %v66_v9  ;;  %s513_s7 = scalar_lea.vmem %s328_s6, 256  ;;  %p518_p2 = scmp.lt.s32.totalorder %s328_s6, %s328_s6 }
  0x2f   :  { %383 = vmatprep.subr.mxu0 %v544_v0  ;;  %398 = vmatprep.subr.mxu1 %v544_v0  ;;  %p514_p1 = scmp.ne.s32.totalorder %s328_s6, %s513_s7  ;;  %p519_p3 = scmp.lt.s32.totalorder %s513_s7, %s513_s7 }
  0x30   :  { %384 = vmatpush3.msra.mxu0 %v71_v8  ;;  %399 = vmatpush3.msra.mxu1 %v65_v11 }
  0x31   :  { %385 = vmatprep.subr.mxu0 %v544_v0  ;;  %400 = vmatprep.subr.mxu1 %v544_v0  ;;  %p520_p4 = por %p519_p3, %p518_p2 }
  0x32   :  { %386 = vmatpush3.msra.mxu0 %v70_v10  ;;  %401 = vmatpush3.msra.mxu1 %v64_v13 }
  0x33   :  { %388 = vmatmul.mubr.msk.f32.vlgmr.msra.gmra.mxu0 %vm83_vm2, %v57_v12  ;;  %417 = vmatprep.subr.mxu0 %v544_v0  ;;  %p521_p5 = pnand %p520_p4, %p514_p1 }
  0x34   :  { %402 = vmatprep.subr.mxu1 %v544_v0  ;;  %418 = vmatpush3.msra.mxu0 %v69_v4 }
  0x35   :  { %403 = vmatpush3.msra.mxu1 %v63_v14  ;;  %419 = vmatprep.subr.mxu0 %v544_v0 }
  0x36   :  { %404 = vmatprep.subr.mxu1 %v544_v0  ;;  %420 = vmatpush3.msra.mxu0 %v68_v5 }
  0x37   :  { %405 = vmatpush3.msra.mxu1 %v62_v15  ;;  %421 = vmatprep.subr.mxu0 %v544_v0 }
  0x38   :  { %406 = vmatprep.subr.mxu1 %v544_v0  ;;  %422 = vmatpush3.msra.mxu0 %v67_v7 }
  0x39   :  { %407 = vmatpush3.msra.mxu1 %v61_v16  ;;  %423 = vmatprep.subr.mxu0 %v544_v0 }
  0x3a   :  { %408 = vmatprep.subr.mxu1 %v544_v0  ;;  %424 = vmatpush3.msra.mxu0 %v66_v9 }
  0x3b   :  { %425 = vmatprep.subr.mxu0 %v544_v0  ;;  %441 = vmatprep.mubr.msk.f32.mxu0 %vm545_vm0, %v544_v0 }
  0x3c   :  { %426 = vmatpush3.msra.mxu0 %v65_v11  ;;  %409 = vmatpush3.msra.mxu1 %v60_v17 }
  0x3d   :  { %427 = vmatprep.subr.mxu0 %v544_v0  ;;  %410 = vmatprep.subr.mxu1 %v544_v0 }
  0x3e   :  { %428 = vmatpush3.msra.mxu0 %v64_v13  ;;  %411 = vmatpush3.msra.mxu1 %v59_v18 }
  0x3f   :  { %429 = vmatprep.subr.mxu0 %v544_v0  ;;  %412 = vmatprep.subr.mxu1 %v544_v0 }
  0x40   :  { %430 = vmatpush3.msra.mxu0 %v63_v14  ;;  %413 = vmatpush3.msra.mxu1 %v58_v19 }
  0x41   :  { %431 = vmatprep.subr.mxu0 %v544_v0  ;;  %314 = vrot.lane.b32.xlu0 %v57_v12, %s546_s5 }
  0x42   :  { %432 = vmatpush3.msra.mxu0 %v62_v15 }
  0x43   :  { %433 = vmatprep.subr.mxu0 %v544_v0 }
  0x44   :  { %434 = vmatpush3.msra.mxu0 %v61_v16 }
  0x45   :  { %435 = vmatprep.subr.mxu0 %v544_v0 }
  0x46   :  { %436 = vmatpush3.msra.mxu0 %v60_v17 }
  0x47   :  { %437 = vmatprep.subr.mxu0 %v544_v0 }
  0x48   :  { %438 = vmatpush3.msra.mxu0 %v59_v18 }
  0x49   :  { %439 = vmatprep.subr.mxu0 %v544_v0 }
  0x4a   :  { %440 = vmatpush3.msra.mxu0 %v58_v19 }
  0xb3   :  { %v315_v29 = vpop.permute.xlu0 %314 }
  0xb4   :  { %320 = vst.msk [vmem:[#allocation8 + $0x8] sm:$0xff] %vm319_vm4, %v315_v29 }
  0xf3   :  { %v157_v21 = vpop.f32.mrf.mxu0 }
  0xf4   :  { %v158_v22 = vadd.f32 %v337_v20, %v157_v21 }
  0xf5   :  { %v389_v23 = vpop.f32.mrf.mxu0 }
  0xf6   :  { %v161_v24 = vmax.f32 %v158_v22, 0.0 }
  0xf8   :  { %415 = vmatmul.mubr.msk.f32.vlgmr.msra.gmra.mxu1 %vm162_vm3, %v161_v24 }
 0x1b8   :  { %v232_v25 = vpop.f32.mrf.mxu1 }
 0x1b9   :  { %v236_v26 = vadd.f32 %v232_v25, %v158_v22 }
 0x1ba   :  { %v416_v27 = vpop.f32.mrf.mxu1 }
 0x1bb   :  { %v237_v28 = vmax.f32 %v236_v26, 0.0 }
 0x1bd   :  { %442 = vmatmul.mubr.msk.f32.vlgmr.msra.gmra.mxu0 %vm162_vm3, %v237_v28 }
 0x27d   :  { %v307_v30 = vpop.f32.mrf.mxu0 }
 0x27e   :  { %v311_v31 = vadd.f32 %v307_v30, %v158_v22 }
 0x27f   :  { %v443_v32 = vpop.f32.mrf.mxu0 }
 0x280   :  { %v312_v33 = vmax.f32 %v311_v31, 0.0 }
 0x282   :  { %313 = vst.msk [vmem:[#allocation8] sm:$0xff] %vm162_vm3, %v312_v33 }
 0x283   :  { %318 = vst.msk [vmem:[#allocation8] sm:$0xff] %vm317_vm5, %v315_v29 }
 0x284   :  { %524 = shalt.err (!%p521_p5)
}
 0x285   :  { %330 = dma.vmem_to_hbm [thread:$0]  %s328_s6, 256, %s631_s4, [#allocation4]  }
 0x286   :  { %537 = dma.done.wait [#allocation4], 256  }
 0x287   :  { %538 = vsyncadd [#allocation4], 4294967040 }
 0x288   :  { %334 = vsyncpa [#allocation3], 1 }
 0x289   :  { %335 = vsyncpa [#allocation6], 1 }
 0x28a   :  { %336 = vsyncpa [#allocation4], 1 }

</bundles_post_ra>
